<compile_context>
chip_gen: v5e
topology: v5e:2x2
jax: 0.10.0
libtpu: 0.0.40
codegen_flags: <defaults>
</compile_context>

<pallas_src>
import numpy as np
import jax
import jax.numpy as jnp
from jax.experimental import pallas as pl
from jax.experimental.pallas import tpu as pltpu


# ----------------------------- Pallas kernel --------------------------------
def _cf_kernel(xt_ref, wft_ref, bf_ref, o_ref):
    # xt_ref:  [H, TN]   float32   (input, batch on the lane axis)
    # wft_ref: [2, H]    float32   (fused conv+fc weight, transposed)
    # bf_ref:  [2, 1]    float32   (fused bias)
    # o_ref:   [2, TN]   float32   (lane-dense output)
    xt = xt_ref[...]
    wft = wft_ref[...]
    acc = jnp.broadcast_to(bf_ref[...], o_ref.shape)
    # H = 4: four broadcast FMAs on the VPU; no MXU push/drain round-trip.
    for k in range(xt.shape[0]):
        acc = acc + wft[:, k:k + 1] * xt[k:k + 1, :]
    o_ref[...] = acc


# ------------------------------- wrapper -------------------------------------
def _round_up(v, m):
    return -(-v // m) * m


@jax.jit
def cf_conv_linear_forward(x_nchw, conv_w, conv_b, fc_w):
    """x_nchw: [N, 1, H, 1]; conv_w: [C, 1, 3, 1]; conv_b: [C]; fc_w: [2, C*2]."""
    N, Cin, H, W = x_nchw.shape
    assert Cin == 1 and W == 1 and H - 2 == 2, "module implies input [N, 1, 4, 1]"
    C = conv_w.shape[0]
    H_out = H - 2  # == 2

    # --- plain-JAX glue: fold conv (im2col) and fc into one [H, 2] weight ----
    x2d = x_nchw[:, 0, :, 0]                       # [N, H]
    wk = conv_w[:, 0, :, 0]                        # [C, 3]
    fc3 = fc_w.reshape(2, C, H_out)                # [o, c, j]
    # contrib[j, k, o] = sum_c wk[c, k] * fc_w[o, c*2 + j]
    contrib = jnp.einsum("ck,ocj->jko", wk, fc3)   # [2, 3, 2]
    # W_fused[h, o] = sum_{j+k==h} contrib[j, k, o]
    W_fused = (jnp.pad(contrib[0], ((0, 1), (0, 0)))
               + jnp.pad(contrib[1], ((1, 0), (0, 0))))          # [H, 2]
    b_fused = jnp.einsum("c,ocj->o", conv_b, fc3)                # [2]

    wft = W_fused.T.astype(jnp.float32)            # [2, H]
    bf = b_fused.reshape(2, 1).astype(jnp.float32)  # [2, 1]

    # --- lane-dense / tiled layout: batch on the lane axis -------------------
    LANE, TN_MAX = 128, 512
    n_pad = _round_up(N, LANE)
    if n_pad <= TN_MAX:
        TN = n_pad
    else:
        TN = TN_MAX
        n_pad = _round_up(n_pad, TN)

    xt = jnp.pad(x2d.T.astype(jnp.float32), ((0, 0), (0, n_pad - N)))  # [H, n_pad]

    out_t = pl.pallas_call(
        _cf_kernel,
        out_shape=jax.ShapeDtypeStruct((2, n_pad), jnp.float32),
        grid=(n_pad // TN,),
        in_specs=[
            pl.BlockSpec((H, TN), lambda i: (0, i),
                         memory_space=pltpu.MemorySpace.VMEM),
            pl.BlockSpec((2, H), lambda i: (0, 0),
                         memory_space=pltpu.MemorySpace.VMEM),
            pl.BlockSpec((2, 1), lambda i: (0, 0),
                         memory_space=pltpu.MemorySpace.VMEM),
        ],
        out_specs=pl.BlockSpec((2, TN), lambda i: (0, i),
                               memory_space=pltpu.MemorySpace.VMEM),
        compiler_params=pltpu.CompilerParams(
            dimension_semantics=("parallel",)),
    )(xt, wft, bf)

    return out_t[:, :N].T                          # [N, 2]


# ------------------------------- reference ----------------------------------
def _reference(x_nchw, conv_w, conv_b, fc_w):
    N = x_nchw.shape[0]
    x = x_nchw[:, 0, :, 0]                         # [N, H]
    wk = conv_w[:, 0, :, 0]                        # [C, 3]
    # conv_out[n, c, j] = sum_k wk[c, k] * x[n, j + k] + b[c],  j in {0, 1}
    conv_out = jnp.stack(
        [jnp.einsum("nk,ck->nc", x[:, j:j + 3], wk) + conv_b for j in range(2)],
        axis=-1,
    )                                               # [N, C, 2]
    flat = conv_out.reshape(N, -1)                  # PyTorch flatten(start_dim=1)
    return flat @ fc_w.T


# --------------------------------- main --------------------------------------
if __name__ == "__main__":
    hidden_channels = 8
    H = 4                                           # input NCHW = [N, 1, 4, 1]

    key = jax.random.PRNGKey(0)
    k_x, k_cw, k_cb, k_fc, k_x2 = jax.random.split(key, 5)

    conv_w = jax.random.normal(k_cw, (hidden_channels, 1, 3, 1), dtype=jnp.float32) * 0.1
    conv_b = jax.random.normal(k_cb, (hidden_channels,), dtype=jnp.float32) * 0.1
    fc_w = jax.random.normal(k_fc, (2, hidden_channels * 2), dtype=jnp.float32) * 0.1

    # small batch (single 128-lane tile, grid=1)
    x_small = jax.random.normal(k_x, (4, 1, H, 1), dtype=jnp.float32)
    out_small = jax.block_until_ready(cf_conv_linear_forward(x_small, conv_w, conv_b, fc_w))
    np.testing.assert_allclose(np.asarray(out_small),
                               np.asarray(_reference(x_small, conv_w, conv_b, fc_w)),
                               rtol=1e-5, atol=1e-5)

    # larger batch (exercises padding + multi-step parallel grid)
    x_big = jax.random.normal(k_x2, (600, 1, H, 1), dtype=jnp.float32)
    out_big = jax.block_until_ready(cf_conv_linear_forward(x_big, conv_w, conv_b, fc_w))
    np.testing.assert_allclose(np.asarray(out_big),
                               np.asarray(_reference(x_big, conv_w, conv_b, fc_w)),
                               rtol=1e-5, atol=1e-5)

    print("KERNEL_OK")
</pallas_src>

<mosaic_0001>
module attributes {stable_mosaic.version = 11 : i64} {
  func.func @_cf_kernel(%arg0: i32, %arg1: memref<4x128xf32, #tpu.memory_space<vmem>>, %arg2: memref<2x4xf32, #tpu.memory_space<vmem>>, %arg3: memref<2x1xf32, #tpu.memory_space<vmem>>, %arg4: memref<2x128xf32, #tpu.memory_space<vmem>>) attributes {dimension_semantics = [#tpu.dimension_semantics<parallel>], iteration_bounds = array<i64: 1>, scalar_prefetch = 0 : i64, scratch_operands = 0 : i64, tpu.core_type = #tpu.core_type<tc>, window_params = [{transform_indices = @transform_0, window_bounds = array<i64: 4, 128>}, {pipeline_mode = #tpu.pipeline_mode<synchronous>, transform_indices = @transform_1, window_bounds = array<i64: 2, 4>}, {pipeline_mode = #tpu.pipeline_mode<synchronous>, transform_indices = @transform_2, window_bounds = array<i64: 2, 1>}, {transform_indices = @transform_3, window_bounds = array<i64: 2, 128>}]} {
    %c0 = arith.constant 0 : index
    %c0_0 = arith.constant 0 : index
    %0 = vector.load %arg1[%c0, %c0_0] : memref<4x128xf32, #tpu.memory_space<vmem>>, vector<4x128xf32>
    %c0_1 = arith.constant 0 : index
    %c0_2 = arith.constant 0 : index
    %1 = vector.load %arg2[%c0_1, %c0_2] : memref<2x4xf32, #tpu.memory_space<vmem>>, vector<2x4xf32>
    %c0_3 = arith.constant 0 : index
    %c0_4 = arith.constant 0 : index
    %2 = vector.load %arg3[%c0_3, %c0_4] : memref<2x1xf32, #tpu.memory_space<vmem>>, vector<2x1xf32>
    %3 = vector.shape_cast %2 : vector<2x1xf32> to vector<2x1xf32>
    %4 = vector.broadcast %3 : vector<2x1xf32> to vector<2x128xf32>
    %5 = vector.extract_strided_slice %1 {offsets = [0, 0], sizes = [2, 1], strides = [1, 1]} : vector<2x4xf32> to vector<2x1xf32>
    %6 = vector.extract_strided_slice %0 {offsets = [0, 0], sizes = [1, 128], strides = [1, 1]} : vector<4x128xf32> to vector<1x128xf32>
    %7 = vector.broadcast %5 : vector<2x1xf32> to vector<2x128xf32>
    %8 = vector.broadcast %6 : vector<1x128xf32> to vector<2x128xf32>
    %9 = arith.mulf %7, %8 : vector<2x128xf32>
    %10 = arith.addf %4, %9 : vector<2x128xf32>
    %11 = vector.extract_strided_slice %1 {offsets = [0, 1], sizes = [2, 1], strides = [1, 1]} : vector<2x4xf32> to vector<2x1xf32>
    %12 = vector.extract_strided_slice %0 {offsets = [1, 0], sizes = [1, 128], strides = [1, 1]} : vector<4x128xf32> to vector<1x128xf32>
    %13 = vector.broadcast %11 : vector<2x1xf32> to vector<2x128xf32>
    %14 = vector.broadcast %12 : vector<1x128xf32> to vector<2x128xf32>
    %15 = arith.mulf %13, %14 : vector<2x128xf32>
    %16 = arith.addf %10, %15 : vector<2x128xf32>
    %17 = vector.extract_strided_slice %1 {offsets = [0, 2], sizes = [2, 1], strides = [1, 1]} : vector<2x4xf32> to vector<2x1xf32>
    %18 = vector.extract_strided_slice %0 {offsets = [2, 0], sizes = [1, 128], strides = [1, 1]} : vector<4x128xf32> to vector<1x128xf32>
    %19 = vector.broadcast %17 : vector<2x1xf32> to vector<2x128xf32>
    %20 = vector.broadcast %18 : vector<1x128xf32> to vector<2x128xf32>
    %21 = arith.mulf %19, %20 : vector<2x128xf32>
    %22 = arith.addf %16, %21 : vector<2x128xf32>
    %23 = vector.extract_strided_slice %1 {offsets = [0, 3], sizes = [2, 1], strides = [1, 1]} : vector<2x4xf32> to vector<2x1xf32>
    %24 = vector.extract_strided_slice %0 {offsets = [3, 0], sizes = [1, 128], strides = [1, 1]} : vector<4x128xf32> to vector<1x128xf32>
    %25 = vector.broadcast %23 : vector<2x1xf32> to vector<2x128xf32>
    %26 = vector.broadcast %24 : vector<1x128xf32> to vector<2x128xf32>
    %27 = arith.mulf %25, %26 : vector<2x128xf32>
    %28 = arith.addf %22, %27 : vector<2x128xf32>
    %c0_5 = arith.constant 0 : index
    %c0_6 = arith.constant 0 : index
    %29 = vector.load %arg4[%c0_5, %c0_6] : memref<2x128xf32, #tpu.memory_space<vmem>>, vector<2x128xf32>
    tpu.vector_store %arg4[%c0_5, %c0_6], %28 {strides = array<i32>} : memref<2x128xf32, #tpu.memory_space<vmem>>, vector<2x128xf32>,
    return
  }
  func.func @transform_0(%arg0: i32) -> (i32, i32) {
    %c0_i32 = arith.constant 0 : i32
    %c0_i32_0 = arith.constant 0 : i32
    return %c0_i32, %arg0 : i32, i32
  }
  func.func @transform_1(%arg0: i32) -> (i32, i32) {
    %c0_i32 = arith.constant 0 : i32
    %c0_i32_0 = arith.constant 0 : i32
    %c0_i32_1 = arith.constant 0 : i32
    return %c0_i32, %c0_i32_0 : i32, i32
  }
  func.func @transform_2(%arg0: i32) -> (i32, i32) {
    %c0_i32 = arith.constant 0 : i32
    %c0_i32_0 = arith.constant 0 : i32
    %c0_i32_1 = arith.constant 0 : i32
    return %c0_i32, %c0_i32_0 : i32, i32
  }
  func.func @transform_3(%arg0: i32) -> (i32, i32) {
    %c0_i32 = arith.constant 0 : i32
    %c0_i32_0 = arith.constant 0 : i32
    return %c0_i32, %arg0 : i32, i32
  }
}

</mosaic_0001>

<bundles_post_ra>
// kernel: cf_conv_linear_forward.1
= control target key start
LH: loop header
LB: loop body
LE: loop exit
PB: predicated region body
PF: predicated region fallthrough
CT: control target
= control target key end

     0   :  { %v65_v0 = vmov 0   ;;  %v66_v1 = vmov 1   ;;  %v67_v3 = vmov 3   ;;  %v68_v5 = vmov 2   ;;  %s101_s1 = inlined_call_operand.vmem [shape: f32[2,4], index: 1, kind: input, shape index: {}]   ;;  %s102_s2 = inlined_call_operand.vmem [shape: f32[2,1], index: 2, kind: input, shape index: {}]   ;;  %s103_s0 = inlined_call_operand.vmem [shape: f32[4,128], index: 0, kind: input, shape index: {}]   ;;  %s104_s3 = inlined_call_operand.vmem [shape: f32[2,128], index: 3, kind: output, shape index: {}]  }
   0x1   :  { %60 = vset.pattern.permute.xlu0 %v65_v0  ;;  %61 = vset.pattern.permute.xlu1 %v66_v1  ;;  %v15_v2 = vld [vmem:[%s101_s1] sm:$0x3] }
   0x2   :  { %24 = vperm.xlu0 %60, %v15_v2   ;;  %31 = vperm.xlu1 %61, %v15_v2   ;;  %v16_v4 = vld [vmem:[%s102_s2] sm:$0x3] }
   0x3   :  { %63 = vset.pattern.permute.xlu2 %v67_v3  ;;  %v14_v7 = vld [vmem:[%s103_s0] sm:$0xf] }
   0x4   :  { %45 = vperm.xlu2 %63, %v15_v2   ;;  %v27_v9 = vperm.slane %v14_v7, 0  ;;  %v34_v10 = vperm.slane %v14_v7, 1  ;;  %v41_v11 = vperm.slane %v14_v7, 2  ;;  %v48_v13 = vperm.slane %v14_v7, 3 }
   0xa   :  { %19 = vperm.xlu0 %60, %v16_v4   ;;  %62 = vset.pattern.permute.xlu1 %v68_v5 }
   0xb   :  { %38 = vperm.xlu1 %62, %v15_v2  }
  0x12   :  { %64 = vset.pattern.permute.xlu0 %v67_v3 }
  0x5e   :  { %v46_v15 = vpop.permute.xlu2 %45 }
  0x5f   :  { %v49_v21 = vmul.f32 %v48_v13, %v46_v15 }
  0x74   :  { %v25_v6 = vpop.permute.xlu0 %24  ;;  %v32_v8 = vpop.permute.xlu1 %31 }
  0x75   :  { %v28_v12 = vmul.f32 %v27_v9, %v25_v6  ;;  %v35_v16 = vmul.f32 %v34_v10, %v32_v8 }
  0x7c   :  { %v20_v14 = vpop.permute.xlu0 %19 }
  0x7d   :  { %v29_v17 = vadd.f32 %v28_v12, %v20_v14  ;;  %v39_v18 = vpop.permute.xlu1 %38 }
  0x7e   :  { %v42_v19 = vmul.f32 %v41_v11, %v39_v18 }
  0x7f   :  { %v36_v20 = vadd.f32 %v35_v16, %v29_v17 }
  0x81   :  { %v43_v22 = vadd.f32 %v42_v19, %v36_v20 }
  0x83   :  { %v50_v23 = vadd.f32 %v49_v21, %v43_v22 }
  0x85   :  { %51 = vst [vmem:[%s104_s3] sm:$0x3] %v50_v23 }

</bundles_post_ra>
